<compile_context>
chip_gen: v7x
topology: tpu7x:2x2x1
jax: 0.10.0
libtpu: 0.0.40
codegen_flags: <defaults>
</compile_context>

<pallas_src>
import functools

import jax
import jax.numpy as jnp
from jax.experimental import pallas as pl
from jax.experimental.pallas import tpu as pltpu


def _qkv_conv_kernel(x_ref, w_ref, b_ref, o_ref, col_ref, *, H, Wp, Cin, ips):
    """Fused q/k/v 3x3 conv for `ips` images of one batch chunk.

    x_ref   : (ips, Cin, (H+3)*Wp)  flattened zero-padded NCHW images
    w_ref   : (Ct, 9*Cin)           fused q/k/v weights, col = tap*Cin + cin
    b_ref   : (Ct, 1)               fused bias
    o_ref   : (ips, Ct, H*Wp)       fused q/k/v output (junk cols included)
    col_ref : (9*Cin, ips*H*Wp)     VMEM im2col scratch
    """
    N = H * Wp

    # im2col: every conv tap is a contiguous lane slice of the flat padded
    # image.  All offsets are static (the loops unroll), reads come straight
    # off the VMEM ref and writes land on static sublane/lane offsets, so the
    # whole 3x3 conv becomes ONE K = 9*Cin contraction on the MXU.
    for bi in range(ips):
        for ky in range(3):
            for kx in range(3):
                tap = ky * 3 + kx
                off = ky * Wp + kx
                col_ref[tap * Cin:(tap + 1) * Cin, bi * N:(bi + 1) * N] = (
                    x_ref[bi, :, off:off + N])

    # Single MXU push (K = 9*Cin) + single fused bias add; accumulation stays
    # inside the MXU instead of 9 VPU adds over the (Ct, N) tile.
    out = jnp.dot(w_ref[...], col_ref[...],
                  preferred_element_type=jnp.float32) + b_ref[...]

    # Lane-dense stores: N is a multiple of 128, so each per-image slice lies
    # on vreg boundaries and the single fused output write is unmasked.
    for bi in range(ips):
        o_ref[bi] = out[:, bi * N:(bi + 1) * N].astype(o_ref.dtype)


def qkv_forward(x_nchw, wq, bq, wk, bk, wv, bv):
    """Equivalent of QueryKeyValue.forward.

    x_nchw : (B, Cin, H, W)        -- PyTorch NCHW input
    w*     : (Cout, Cin, 3, 3)     -- PyTorch OIHW conv weights
    b*     : (Cout,)               -- conv biases
    returns (q, k, v) each in NCHW.
    """
    B, Cin, H, W = x_nchw.shape
    Kd = wq.shape[0]
    Vd = wv.shape[0]
    Ct = 2 * Kd + Vd

    # Padded width: >= W+2 (so junk columns never wrap into valid ones) and,
    # if a nearby value exists, chosen so H*Wp is a multiple of 128 for
    # unmasked lane-dense output stores (H=16, W=16 -> Wp=24, N=384).
    Wp = W + 2
    while (H * Wp) % 128 != 0 and Wp < W + 2 + 128:
        Wp += 1
    if (H * Wp) % 128 != 0:
        Wp = W + 2                  # give up on alignment (perf-only)
    N = H * Wp                      # output columns per image (incl. junk)
    Lp = (H + 3) * Wp               # flat padded-image length

    # Zero-pad (1 top, 2 bottom, 1 left, Wp-W-1 right) and flatten spatial
    # dims (metadata-only reshape).  No layout transpose needed.
    x_pad = jnp.pad(x_nchw, ((0, 0), (0, 0), (1, 2), (1, Wp - W - 1)))
    x_flat = x_pad.reshape(B, Cin, Lp)

    # Fused q/k/v weights laid out for a single K = 9*Cin contraction
    # (column index = tap*Cin + cin, tap = ky*3 + kx); fused bias (Ct, 1).
    w_cat = jnp.concatenate([wq, wk, wv], axis=0)                  # (Ct,Cin,3,3)
    w_fused = jnp.transpose(w_cat, (0, 2, 3, 1)).reshape(Ct, 9 * Cin)
    b_fused = jnp.concatenate([bq, bk, bv], axis=0).reshape(Ct, 1)

    # Batch folding: keep >=2 grid steps so both v7x TensorCores get work,
    # while minimizing step count (and its ~0.35us/step overhead) on the
    # single-TC v5e/v6e.  VMEM per step is tens of KB -> far under limits.
    if B >= 2 and B % 2 == 0:
        ips = B // 2                # images per grid step
    else:
        ips = 1
    steps = B // ips

    kernel = functools.partial(_qkv_conv_kernel, H=H, Wp=Wp, Cin=Cin, ips=ips)

    out = pl.pallas_call(
        kernel,
        out_shape=jax.ShapeDtypeStruct((B, Ct, N), x_nchw.dtype),
        grid=(steps,),
        in_specs=[
            pl.BlockSpec((ips, Cin, Lp), lambda g: (g, 0, 0)),
            pl.BlockSpec((Ct, 9 * Cin), lambda g: (0, 0)),
            pl.BlockSpec((Ct, 1), lambda g: (0, 0)),
        ],
        out_specs=pl.BlockSpec((ips, Ct, N), lambda g: (g, 0, 0)),
        scratch_shapes=[pltpu.VMEM((9 * Cin, ips * N), jnp.float32)],
        compiler_params=pltpu.CompilerParams(
            dimension_semantics=("parallel",)),
    )(x_flat, w_fused, b_fused)

    # Single post-pass: the q/k/v split and the junk-column strip are the
    # same slice (no separate strip pass).  Outputs are NCHW (B, Cout, H, W).
    out4 = out.reshape(B, Ct, H, Wp)
    q = out4[:, :Kd, :, :W]
    k = out4[:, Kd:2 * Kd, :, :W]
    v = out4[:, 2 * Kd:, :, :W]
    return q, k, v


def _reference_conv(x_nchw, w, b):
    out = jax.lax.conv_general_dilated(
        x_nchw, w, window_strides=(1, 1), padding=((1, 1), (1, 1)),
        dimension_numbers=("NCHW", "OIHW", "NCHW"))
    return out + b.reshape(1, -1, 1, 1)


if __name__ == "__main__":
    # module config: indim=4, keydim=8, valdim=16; input (2, 4, 16, 16)
    B, Cin, H, W = 2, 4, 16, 16
    keydim, valdim = 8, 16

    key = jax.random.PRNGKey(0)
    kx, kwq, kbq, kwk, kbk, kwv, kbv = jax.random.split(key, 7)

    x = jax.random.normal(kx, (B, Cin, H, W), dtype=jnp.float32)

    # deterministic synthetic parameter init (shapes match nn.Conv2d)
    scale = 1.0 / (Cin * 9) ** 0.5
    wq = jax.random.uniform(kwq, (keydim, Cin, 3, 3), jnp.float32, -scale, scale)
    bq = jax.random.uniform(kbq, (keydim,), jnp.float32, -scale, scale)
    wk = jax.random.uniform(kwk, (keydim, Cin, 3, 3), jnp.float32, -scale, scale)
    bk = jax.random.uniform(kbk, (keydim,), jnp.float32, -scale, scale)
    wv = jax.random.uniform(kwv, (valdim, Cin, 3, 3), jnp.float32, -scale, scale)
    bv = jax.random.uniform(kbv, (valdim,), jnp.float32, -scale, scale)

    q, k, v = jax.block_until_ready(
        jax.jit(qkv_forward)(x, wq, bq, wk, bk, wv, bv))

    # correctness check against XLA's conv
    q_ref = _reference_conv(x, wq, bq)
    k_ref = _reference_conv(x, wk, bk)
    v_ref = _reference_conv(x, wv, bv)

    assert q.shape == (B, keydim, H, W)
    assert k.shape == (B, keydim, H, W)
    assert v.shape == (B, valdim, H, W)
    for got, ref in ((q, q_ref), (k, k_ref), (v, v_ref)):
        assert jnp.allclose(got, ref, atol=1e-4, rtol=1e-4), float(
            jnp.max(jnp.abs(got - ref)))

    print("KERNEL_OK")
</pallas_src>

<mosaic_0001>
module attributes {stable_mosaic.version = 11 : i64} {
  func.func @_qkv_conv_kernel(%arg0: i32, %arg1: memref<1x4x456xf32, #tpu.memory_space<vmem>>, %arg2: memref<32x36xf32, #tpu.memory_space<vmem>>, %arg3: memref<32x1xf32, #tpu.memory_space<vmem>>, %arg4: memref<1x32x384xf32, #tpu.memory_space<vmem>>, %arg5: memref<36x384xf32, #tpu.memory_space<vmem>>) attributes {dimension_semantics = [#tpu.dimension_semantics<parallel>], iteration_bounds = array<i64: 2>, scalar_prefetch = 0 : i64, scratch_operands = 1 : i64, tpu.core_type = #tpu.core_type<tc>, window_params = [{transform_indices = @transform_0, window_bounds = array<i64: 1, 4, 456>}, {pipeline_mode = #tpu.pipeline_mode<synchronous>, transform_indices = @transform_1, window_bounds = array<i64: 32, 36>}, {pipeline_mode = #tpu.pipeline_mode<synchronous>, transform_indices = @transform_2, window_bounds = array<i64: 32, 1>}, {transform_indices = @transform_3, window_bounds = array<i64: 1, 32, 384>}]} {
    %c0 = arith.constant 0 : index
    %c0_0 = arith.constant 0 : index
    %c0_1 = arith.constant 0 : index
    %0 = vector.load %arg1[%c0, %c0_0, %c0_1] : memref<1x4x456xf32, #tpu.memory_space<vmem>>, vector<1x4x384xf32>
    %1 = vector.shape_cast %0 : vector<1x4x384xf32> to vector<4x384xf32>
    %c0_2 = arith.constant 0 : index
    %c0_3 = arith.constant 0 : index
    %2 = vector.load %arg5[%c0_2, %c0_3] : memref<36x384xf32, #tpu.memory_space<vmem>>, vector<4x384xf32>
    tpu.vector_store %arg5[%c0_2, %c0_3], %1 {strides = array<i32>} : memref<36x384xf32, #tpu.memory_space<vmem>>, vector<4x384xf32>,
    %c0_4 = arith.constant 0 : index
    %c0_5 = arith.constant 0 : index
    %c1 = arith.constant 1 : index
    %3 = vector.load %arg1[%c0_4, %c0_5, %c1] : memref<1x4x456xf32, #tpu.memory_space<vmem>>, vector<1x4x384xf32>
    %4 = vector.shape_cast %3 : vector<1x4x384xf32> to vector<4x384xf32>
    %c4 = arith.constant 4 : index
    %c0_6 = arith.constant 0 : index
    %5 = vector.load %arg5[%c4, %c0_6] : memref<36x384xf32, #tpu.memory_space<vmem>>, vector<4x384xf32>
    tpu.vector_store %arg5[%c4, %c0_6], %4 {strides = array<i32>} : memref<36x384xf32, #tpu.memory_space<vmem>>, vector<4x384xf32>,
    %c0_7 = arith.constant 0 : index
    %c0_8 = arith.constant 0 : index
    %c2 = arith.constant 2 : index
    %6 = vector.load %arg1[%c0_7, %c0_8, %c2] : memref<1x4x456xf32, #tpu.memory_space<vmem>>, vector<1x4x384xf32>
    %7 = vector.shape_cast %6 : vector<1x4x384xf32> to vector<4x384xf32>
    %c8 = arith.constant 8 : index
    %c0_9 = arith.constant 0 : index
    %8 = vector.load %arg5[%c8, %c0_9] : memref<36x384xf32, #tpu.memory_space<vmem>>, vector<4x384xf32>
    tpu.vector_store %arg5[%c8, %c0_9], %7 {strides = array<i32>} : memref<36x384xf32, #tpu.memory_space<vmem>>, vector<4x384xf32>,
    %c0_10 = arith.constant 0 : index
    %c0_11 = arith.constant 0 : index
    %c24 = arith.constant 24 : index
    %9 = vector.load %arg1[%c0_10, %c0_11, %c24] : memref<1x4x456xf32, #tpu.memory_space<vmem>>, vector<1x4x384xf32>
    %10 = vector.shape_cast %9 : vector<1x4x384xf32> to vector<4x384xf32>
    %c12 = arith.constant 12 : index
    %c0_12 = arith.constant 0 : index
    %11 = vector.load %arg5[%c12, %c0_12] : memref<36x384xf32, #tpu.memory_space<vmem>>, vector<4x384xf32>
    tpu.vector_store %arg5[%c12, %c0_12], %10 {strides = array<i32>} : memref<36x384xf32, #tpu.memory_space<vmem>>, vector<4x384xf32>,
    %c0_13 = arith.constant 0 : index
    %c0_14 = arith.constant 0 : index
    %c25 = arith.constant 25 : index
    %12 = vector.load %arg1[%c0_13, %c0_14, %c25] : memref<1x4x456xf32, #tpu.memory_space<vmem>>, vector<1x4x384xf32>
    %13 = vector.shape_cast %12 : vector<1x4x384xf32> to vector<4x384xf32>
    %c16 = arith.constant 16 : index
    %c0_15 = arith.constant 0 : index
    %14 = vector.load %arg5[%c16, %c0_15] : memref<36x384xf32, #tpu.memory_space<vmem>>, vector<4x384xf32>
    tpu.vector_store %arg5[%c16, %c0_15], %13 {strides = array<i32>} : memref<36x384xf32, #tpu.memory_space<vmem>>, vector<4x384xf32>,
    %c0_16 = arith.constant 0 : index
    %c0_17 = arith.constant 0 : index
    %c26 = arith.constant 26 : index
    %15 = vector.load %arg1[%c0_16, %c0_17, %c26] : memref<1x4x456xf32, #tpu.memory_space<vmem>>, vector<1x4x384xf32>
    %16 = vector.shape_cast %15 : vector<1x4x384xf32> to vector<4x384xf32>
    %c20 = arith.constant 20 : index
    %c0_18 = arith.constant 0 : index
    %17 = vector.load %arg5[%c20, %c0_18] : memref<36x384xf32, #tpu.memory_space<vmem>>, vector<4x384xf32>
    tpu.vector_store %arg5[%c20, %c0_18], %16 {strides = array<i32>} : memref<36x384xf32, #tpu.memory_space<vmem>>, vector<4x384xf32>,
    %c0_19 = arith.constant 0 : index
    %c0_20 = arith.constant 0 : index
    %c48 = arith.constant 48 : index
    %18 = vector.load %arg1[%c0_19, %c0_20, %c48] : memref<1x4x456xf32, #tpu.memory_space<vmem>>, vector<1x4x384xf32>
    %19 = vector.shape_cast %18 : vector<1x4x384xf32> to vector<4x384xf32>
    %c24_21 = arith.constant 24 : index
    %c0_22 = arith.constant 0 : index
    %20 = vector.load %arg5[%c24_21, %c0_22] : memref<36x384xf32, #tpu.memory_space<vmem>>, vector<4x384xf32>
    tpu.vector_store %arg5[%c24_21, %c0_22], %19 {strides = array<i32>} : memref<36x384xf32, #tpu.memory_space<vmem>>, vector<4x384xf32>,
    %c0_23 = arith.constant 0 : index
    %c0_24 = arith.constant 0 : index
    %c49 = arith.constant 49 : index
    %21 = vector.load %arg1[%c0_23, %c0_24, %c49] : memref<1x4x456xf32, #tpu.memory_space<vmem>>, vector<1x4x384xf32>
    %22 = vector.shape_cast %21 : vector<1x4x384xf32> to vector<4x384xf32>
    %c28 = arith.constant 28 : index
    %c0_25 = arith.constant 0 : index
    %23 = vector.load %arg5[%c28, %c0_25] : memref<36x384xf32, #tpu.memory_space<vmem>>, vector<4x384xf32>
    tpu.vector_store %arg5[%c28, %c0_25], %22 {strides = array<i32>} : memref<36x384xf32, #tpu.memory_space<vmem>>, vector<4x384xf32>,
    %c0_26 = arith.constant 0 : index
    %c0_27 = arith.constant 0 : index
    %c50 = arith.constant 50 : index
    %24 = vector.load %arg1[%c0_26, %c0_27, %c50] : memref<1x4x456xf32, #tpu.memory_space<vmem>>, vector<1x4x384xf32>
    %25 = vector.shape_cast %24 : vector<1x4x384xf32> to vector<4x384xf32>
    %c32 = arith.constant 32 : index
    %c0_28 = arith.constant 0 : index
    %26 = vector.load %arg5[%c32, %c0_28] : memref<36x384xf32, #tpu.memory_space<vmem>>, vector<4x384xf32>
    tpu.vector_store %arg5[%c32, %c0_28], %25 {strides = array<i32>} : memref<36x384xf32, #tpu.memory_space<vmem>>, vector<4x384xf32>,
    %c0_29 = arith.constant 0 : index
    %c0_30 = arith.constant 0 : index
    %27 = vector.load %arg2[%c0_29, %c0_30] : memref<32x36xf32, #tpu.memory_space<vmem>>, vector<32x36xf32>
    %c0_31 = arith.constant 0 : index
    %c0_32 = arith.constant 0 : index
    %28 = vector.load %arg5[%c0_31, %c0_32] : memref<36x384xf32, #tpu.memory_space<vmem>>, vector<36x384xf32>
    %cst = arith.constant dense<0.000000e+00> : vector<32x384xf32>
    %29 = tpu.matmul %27, %28, %cst {dimension_numbers = #tpu.dot_dimension_numbers<[1], [0], [0], [1], [0, 0, 1, 1], [], []>} : vector<32x36xf32>, vector<36x384xf32>, vector<32x384xf32> -> vector<32x384xf32>
    %c0_33 = arith.constant 0 : index
    %c0_34 = arith.constant 0 : index
    %30 = vector.load %arg3[%c0_33, %c0_34] : memref<32x1xf32, #tpu.memory_space<vmem>>, vector<32x1xf32>
    %31 = vector.broadcast %30 : vector<32x1xf32> to vector<32x384xf32>
    %32 = arith.addf %29, %31 : vector<32x384xf32>
    %c0_35 = arith.constant 0 : index
    %c0_36 = arith.constant 0 : index
    %c0_37 = arith.constant 0 : index
    %33 = vector.load %arg4[%c0_35, %c0_36, %c0_37] : memref<1x32x384xf32, #tpu.memory_space<vmem>>, vector<1x32x384xf32>
    %34 = vector.shape_cast %33 : vector<1x32x384xf32> to vector<32x384xf32>
    %35 = vector.shape_cast %32 : vector<32x384xf32> to vector<1x32x384xf32>
    tpu.vector_store %arg4[%c0_35, %c0_36, %c0_37], %35 {strides = array<i32>} : memref<1x32x384xf32, #tpu.memory_space<vmem>>, vector<1x32x384xf32>,
    return
  }
  func.func @transform_0(%arg0: i32) -> (i32, i32, i32) {
    %c0_i32 = arith.constant 0 : i32
    %c0_i32_0 = arith.constant 0 : i32
    %c0_i32_1 = arith.constant 0 : i32
    return %arg0, %c0_i32, %c0_i32_0 : i32, i32, i32
  }
  func.func @transform_1(%arg0: i32) -> (i32, i32) {
    %c0_i32 = arith.constant 0 : i32
    %c0_i32_0 = arith.constant 0 : i32
    %c0_i32_1 = arith.constant 0 : i32
    return %c0_i32, %c0_i32_0 : i32, i32
  }
  func.func @transform_2(%arg0: i32) -> (i32, i32) {
    %c0_i32 = arith.constant 0 : i32
    %c0_i32_0 = arith.constant 0 : i32
    %c0_i32_1 = arith.constant 0 : i32
    return %c0_i32, %c0_i32_0 : i32, i32
  }
  func.func @transform_3(%arg0: i32) -> (i32, i32, i32) {
    %c0_i32 = arith.constant 0 : i32
    %c0_i32_0 = arith.constant 0 : i32
    %c0_i32_1 = arith.constant 0 : i32
    return %arg0, %c0_i32, %c0_i32_0 : i32, i32, i32
  }
}

</mosaic_0001>

<bundles_post_ra>
// kernel: qkv_forward.1
= control target key start
LH: loop header
LB: loop body
LE: loop exit
PB: predicated region body
PF: predicated region fallthrough
CT: control target
= control target key end

     0   :  { %s804_s12 = smov 0   ;;  %s935_s0 = inlined_call_operand.vmem [shape: f32[2,4,456], index: 0, kind: input, shape index: {}]   ;;  %s936_s1 = inlined_call_operand.vmem [shape: f32[32,36], index: 1, kind: input, shape index: {}]   ;;  %s937_s2 = inlined_call_operand.vmem [shape: f32[32,1], index: 2, kind: input, shape index: {}]   ;;  %s938_s3 = inlined_call_operand.vmem [shape: f32[2,32,384], index: 3, kind: output, shape index: {}]  }
   0x1 LB: > { %s678_s13 = sadd.s32 4294967295, %s772_s12   ;;  %p682_p0 = scmp.ge.s32.totalorder %s772_s12, 1  ;;  %s772_s12 = sphi %s804_s12, %s13_s12  }
   0x2   : > { %p137_p1 = scmp.lt.s32.totalorder %s772_s12, 3 }
   0x4   : > { %p138_p2 = pnand %p682_p0, %p137_p1 }
   0x5   : > { %p161_p3 = scmp.lt.s32.totalorder (!%p138_p2), %s678_s13, 1  ;;  %s774_s18 = smov (!%p138_p2), 126   ;;  %v835_v7 = vld [vmem:[%s936_s1] sm:$0xff] (!%p138_p2)  ;;  %vm414_vm0 = vcmask (!%p138_p2), 293888   ;;  %v782_v8 = vmov (!%p138_p2), 0.0   ;;  %v391_v10 = vld [vmem:[%s937_s2 + $0x8] sm:$0xff] (!%p138_p2) }
   0x6   : > { %141 = sbr.rel (%p138_p2) target bundleno = 429 (0x1ad), region = 32  ;;  %s775_s19 = smov (!%p138_p2), 127   ;;  %501 = vmatprep.mubr.f32.mxu0 (!%p138_p2), %v782_v8  ;;  %719 = vmatprep.mubr.msk.f32.mxu1 (!%p138_p2), %vm414_vm0, %v835_v7  ;;  %v390_v9 = vld [vmem:[%s937_s2] sm:$0xff] (!%p138_p2)  ;;  %v783_v11 = vmov (!%p138_p2), 0   ;;  %v392_v12 = vld [vmem:[%s937_s2 + $0x10] sm:$0xff] (!%p138_p2)  ;;  %v393_v13 = vld [vmem:[%s937_s2 + $0x18] sm:$0xff] (!%p138_p2) }
   0x7   : > { %s776_s20 = smov (!%p138_p2), 104   ;;  %s777_s21 = smov (!%p138_p2), 103   ;;  %760 = vset.pattern.permute.xlu0 (!%p138_p2), %v783_v11  ;;  %761 = vset.pattern.permute.xlu1 (!%p138_p2), %v783_v11  ;;  %vm217_vm1 = vcmask (!%p138_p2), 1031168   ;;  %vm241_vm2 = vcmask (!%p138_p2), 850944   ;;  %vm193_vm3 = vcmask (!%p138_p2), 1039360   ;;  %vm265_vm4 = vcmask (!%p138_p2), 842752  }
   0x8   : > { %s778_s22 = smov (!%p138_p2), 102   ;;  %s779_s23 = smov (!%p138_p2), 80   ;;  %vm289_vm5 = vcmask (!%p138_p2), 834560   ;;  %vm313_vm6 = vcmask (!%p138_p2), 654336   ;;  %vm337_vm7 = vcmask (!%p138_p2), 646144   ;;  %vm361_vm8 = vcmask (!%p138_p2), 637952  }
   0x9   : > { %s780_s24 = smov (!%p138_p2), 79   ;;  %s781_s25 = smov (!%p138_p2), 78   ;;  %vm427_vm9 = vcmask (!%p138_p2), 1043456  }
   0xd   : > { %s940_s13 = smov (!%p161_p3, %s678_s13), 1 }
   0xe   : > { %s699_s14 = sshll.u32 %s940_s13, 4 }
   0xf   : > { %s165_s17 = scalar_lea.vmem %s935_s0, %s699_s14 }
  0x10   : > { %v204_v0 = vld [vmem:[%s165_s17 + $0x8] sm:$0xff]  ;;  %v179_v1 = vld [vmem:[%s165_s17] sm:$0xff] }
  0x11   : > { %213 = vrot.lane.b32.xlu1 %v204_v0, %s774_s18  ;;  %187 = vrot.lane.b32.xlu0 %v179_v1, %s775_s19  ;;  %v207_v2 = vcombine.high %v179_v1, %v179_v1  ;;  %176 = vst [vmem:[#allocation2] sm:$0xf] %v179_v1  ;;  %v232_v3 = vcombine.low %v204_v0, %v204_v0  ;;  %v172_v5 = vld [vmem:[%s165_s17 + $0x8] sm:$0xf]  ;;  %s741_s17 = smul.u32 96, %s940_s13 }
  0x12   : > { %v183_v4 = vcombine.low %v179_v1, %v179_v1  ;;  %178 = vst [vmem:[#allocation2 + $0x10] sm:$0xf] %v172_v5  ;;  %v208_v6 = vcombine.high %v204_v0, %v204_v0 }
  0x13   : > { %177 = vst [vmem:[#allocation2 + $0x8] sm:$0xf] %v207_v2 }
  0x15   : > { %211 = vrot.lane.b32.xlu1 %v207_v2, %s774_s18  ;;  %235 = vrot.lane.b32.xlu0 %v179_v1, %s776_s20 }
  0x19   : > { %237 = vrot.lane.b32.xlu1 %v232_v3, %s776_s20  ;;  %189 = vrot.lane.b32.xlu0 %v232_v3, %s775_s19 }
  0x1d   : > { %209 = vrot.lane.b32.xlu1 %v179_v1, %s774_s18  ;;  %185 = vrot.lane.b32.xlu0 %v183_v4, %s775_s19 }
  0x21   : > { %259 = vrot.lane.b32.xlu1 %v207_v2, %s777_s21  ;;  %233 = vrot.lane.b32.xlu0 %v183_v4, %s776_s20 }
  0x25   : > { %283 = vrot.lane.b32.xlu1 %v179_v1, %s778_s22  ;;  %261 = vrot.lane.b32.xlu0 %v204_v0, %s777_s21 }
  0x29   : > { %307 = vrot.lane.b32.xlu1 %v207_v2, %s779_s23  ;;  %285 = vrot.lane.b32.xlu0 %v232_v3, %s778_s22 }
  0x2d   : > { %331 = vrot.lane.b32.xlu1 %v179_v1, %s780_s24  ;;  %309 = vrot.lane.b32.xlu0 %v204_v0, %s779_s23 }
  0x31   : > { %257 = vrot.lane.b32.xlu1 %v179_v1, %s777_s21  ;;  %333 = vrot.lane.b32.xlu0 %v232_v3, %s780_s24 }
  0x35   : > { %305 = vrot.lane.b32.xlu1 %v179_v1, %s779_s23  ;;  %281 = vrot.lane.b32.xlu0 %v183_v4, %s778_s22 }
  0x39   : > { %191 = vrot.lane.b32.xlu1 %v204_v0, %s775_s19  ;;  %329 = vrot.lane.b32.xlu0 %v183_v4, %s780_s24 }
  0x3d   : > { %239 = vrot.lane.b32.xlu1 %v204_v0, %s776_s20  ;;  %215 = vrot.lane.b32.xlu0 %v208_v6, %s774_s18  ;;  %s918_s20 = scalar_lea.vmem %s938_s3, %s741_s17 }
  0x41   : > { %357 = vrot.lane.b32.xlu1 %v204_v0, %s781_s25  ;;  %355 = vrot.lane.b32.xlu0 %v207_v2, %s781_s25 }
  0x45   : > { %263 = vrot.lane.b32.xlu1 %v208_v6, %s777_s21  ;;  %353 = vrot.lane.b32.xlu0 %v179_v1, %s781_s25 }
  0x49   : > { %311 = vrot.lane.b32.xlu1 %v208_v6, %s779_s23  ;;  %287 = vrot.lane.b32.xlu0 %v204_v0, %s778_s22 }
  0x4d   : > { %359 = vrot.lane.b32.xlu1 %v208_v6, %s781_s25  ;;  %335 = vrot.lane.b32.xlu0 %v204_v0, %s780_s24 }
  0x51   : > { %396 = vperm.xlu0 %760, %v390_v9   ;;  %401 = vperm.xlu1 %761, %v391_v10  }
  0x55   : > { %406 = vperm.xlu1 %761, %v392_v12   ;;  %411 = vperm.xlu0 %760, %v393_v13  }
  0x83   : > { %v854_v14 = vpop.permute.xlu1 %213  ;;  %v188_v15 = vpop.permute.xlu0 %187 }
  0x87   : > { %v212_v16 = vpop.permute.xlu1 %211  ;;  %v236_v17 = vpop.permute.xlu0 %235 }
  0x88   : > { %v219_v18 = vsel %vm217_vm1, %v212_v16, %v854_v14 }
  0x89   : > { %225 = vst [vmem:[#allocation2 + $0x20] sm:$0xf] %v219_v18 }
  0x8b   : > { %v858_v19 = vpop.permute.xlu1 %237  ;;  %v190_v20 = vpop.permute.xlu0 %189 }
  0x8c   : > { %v243_v21 = vsel %vm241_vm2, %v236_v17, %v858_v19  ;;  %v195_v22 = vsel %vm193_vm3, %v188_v15, %v190_v20 }
  0x8d   : > { %249 = vst [vmem:[#allocation2 + $0x20] sm:$0xf0] %v243_v21  ;;  %201 = vst [vmem:[#allocation2 + $0x8] sm:$0xf0] %v195_v22 }
  0x8f   : > { %v210_v23 = vpop.permute.xlu1 %209  ;;  %v186_v24 = vpop.permute.xlu0 %185 }
  0x90   : > { %v218_v25 = vsel %vm217_vm1, %v210_v23, %v212_v16  ;;  %v194_v26 = vsel %vm193_vm3, %v186_v24, %v188_v15 }
  0x91   : > { %224 = vst [vmem:[#allocation2 + $0x18] sm:$0xf] %v218_v25  ;;  %200 = vst [vmem:[#allocation2] sm:$0xf0] %v194_v26  ;;  %v372_v25 = vld [vmem:[%s936_s1 + $0x8] sm:$0xff]  ;;  %v373_v26 = vld [vmem:[%s936_s1 + $0x10] sm:$0xff] }
  0x93   : > { %v260_v27 = vpop.permute.xlu1 %259  ;;  %v234_v28 = vpop.permute.xlu0 %233 }
  0x94   : > { %v242_v29 = vsel %vm241_vm2, %v234_v28, %v236_v17  ;;  %v376_v30 = vld [vmem:[#allocation2 + $0x8] sm:$0xff]  ;;  %v379_v31 = vld [vmem:[#allocation2 + $0x20] sm:$0xff] }
  0x95   : > { %248 = vst [vmem:[#allocation2 + $0x18] sm:$0xf0] %v242_v29  ;;  %v725_v32 = vpack.c.bf16 %v379_v31, %v376_v30 }
  0x97   : > { %v284_v33 = vpop.permute.xlu1 %283  ;;  %v262_v34 = vpop.permute.xlu0 %261  ;;  %726 = vmatprep.subr.bf16.mxu0 %v725_v32 }
  0x98   : > { %v267_v35 = vsel %vm265_vm4, %v260_v27, %v262_v34  ;;  %v375_v39 = vld [vmem:[#allocation2] sm:$0xff] }
  0x99   : > { %273 = vst [vmem:[#allocation2 + $0x38] sm:$0xf] %v267_v35 }
  0x9b   : > { %v308_v36 = vpop.permute.xlu1 %307  ;;  %v867_v37 = vpop.permute.xlu0 %285 }
  0x9c   : > { %v291_v38 = vsel %vm289_vm5, %v284_v33, %v867_v37  ;;  %v378_v40 = vld [vmem:[#allocation2 + $0x18] sm:$0xff] }
  0x9d   : > { %297 = vst [vmem:[#allocation2 + $0x38] sm:$0xf0] %v291_v38  ;;  %v727_v41 = vpack.c.bf16 %v378_v40, %v375_v39 }
  0x9f   : > { %v332_v42 = vpop.permute.xlu1 %331  ;;  %v310_v43 = vpop.permute.xlu0 %309  ;;  %728 = vmatpush1.bf16.msra.mxu0 %v727_v41 }
  0xa0   : > { %v315_v44 = vsel %vm313_vm6, %v308_v36, %v310_v43 }
  0xa1   : > { %321 = vst [vmem:[#allocation2 + $0x50] sm:$0xf] %v315_v44 }
  0xa3   : > { %v258_v45 = vpop.permute.xlu1 %257  ;;  %v334_v46 = vpop.permute.xlu0 %333 }
  0xa4   : > { %v266_v47 = vsel %vm265_vm4, %v258_v45, %v260_v27  ;;  %v339_v48 = vsel %vm337_vm7, %v332_v42, %v334_v46  ;;  %v382_v57 = vld [vmem:[#allocation2 + $0x38] sm:$0xff] }
  0xa5   : > { %272 = vst [vmem:[#allocation2 + $0x30] sm:$0xf] %v266_v47  ;;  %345 = vst [vmem:[#allocation2 + $0x50] sm:$0xf0] %v339_v48 }
  0xa7   : > { %v306_v49 = vpop.permute.xlu1 %305  ;;  %v282_v50 = vpop.permute.xlu0 %281 }
  0xa8   : > { %v314_v51 = vsel %vm313_vm6, %v306_v49, %v308_v36  ;;  %v290_v52 = vsel %vm289_vm5, %v282_v50, %v284_v33 }
  0xa9   : > { %320 = vst [vmem:[#allocation2 + $0x48] sm:$0xf] %v314_v51  ;;  %296 = vst [vmem:[#allocation2 + $0x30] sm:$0xf0] %v290_v52 }
  0xab   : > { %v192_v53 = vpop.permute.xlu1 %191  ;;  %v330_v54 = vpop.permute.xlu0 %329 }
  0xac   : > { %v196_v55 = vsel %vm193_vm3, %v190_v20, %v192_v53  ;;  %v338_v56 = vsel %vm337_vm7, %v330_v54, %v332_v42  ;;  %v385_v58 = vld [vmem:[#allocation2 + $0x50] sm:$0xff] }
  0xad   : > { %202 = vst [vmem:[#allocation2 + $0x10] sm:$0xf0] %v196_v55  ;;  %344 = vst [vmem:[#allocation2 + $0x48] sm:$0xf0] %v338_v56  ;;  %v729_v59 = vpack.c.bf16 %v385_v58, %v382_v57 }
  0xaf   : > { %v240_v60 = vpop.permute.xlu1 %239  ;;  %v216_v61 = vpop.permute.xlu0 %215  ;;  %730 = vmatprep.subr.bf16.mxu0 %v729_v59 }
  0xb0   : > { %v244_v62 = vsel %vm241_vm2, %v858_v19, %v240_v60  ;;  %v220_v63 = vsel %vm217_vm1, %v854_v14, %v216_v61  ;;  %v381_v3 = vld [vmem:[#allocation2 + $0x30] sm:$0xff] }
  0xb1   : > { %250 = vst [vmem:[#allocation2 + $0x28] sm:$0xf0] %v244_v62  ;;  %226 = vst [vmem:[#allocation2 + $0x28] sm:$0xf] %v220_v63 }
  0xb3   : > { %v358_v0 = vpop.permute.xlu1 %357  ;;  %v356_v1 = vpop.permute.xlu0 %355 }
  0xb4   : > { %v363_v2 = vsel %vm361_vm8, %v356_v1, %v358_v0  ;;  %v384_v4 = vld [vmem:[#allocation2 + $0x48] sm:$0xff]  ;;  %v377_v12 = vld [vmem:[#allocation2 + $0x10] sm:$0xff] }
  0xb5   : > { %369 = vst [vmem:[#allocation2 + $0x68] sm:$0xf] %v363_v2  ;;  %v731_v5 = vpack.c.bf16 %v384_v4, %v381_v3 }
  0xb7   : > { %v264_v6 = vpop.permute.xlu1 %263  ;;  %v354_v9 = vpop.permute.xlu0 %353  ;;  %732 = vmatpush1.bf16.msra.mxu0 %v731_v5 }
  0xb8   : > { %v268_v10 = vsel %vm265_vm4, %v262_v34, %v264_v6  ;;  %v362_v11 = vsel %vm361_vm8, %v354_v9, %v356_v1  ;;  %v380_v13 = vld [vmem:[#allocation2 + $0x28] sm:$0xff] }
  0xb9   : > { %274 = vst [vmem:[#allocation2 + $0x40] sm:$0xf] %v268_v10  ;;  %368 = vst [vmem:[#allocation2 + $0x60] sm:$0xf] %v362_v11  ;;  %v733_v14 = vpack.c.bf16 %v380_v13, %v377_v12 }
  0xbb   : > { %v312_v15 = vpop.permute.xlu1 %311  ;;  %v288_v16 = vpop.permute.xlu0 %287  ;;  %734 = vmatprep.subr.bf16.mxu1 %v733_v14 }
  0xbc   : > { %v316_v17 = vsel %vm313_vm6, %v310_v43, %v312_v15  ;;  %v292_v18 = vsel %vm289_vm5, %v867_v37, %v288_v16  ;;  %736 = vmatpush3.bf16.msra.mxu1 %v733_v14  ;;  %v388_v19 = vld [vmem:[#allocation2 + $0x68] sm:$0xf] }
  0xbd   : > { %322 = vst [vmem:[#allocation2 + $0x58] sm:$0xf] %v316_v17  ;;  %298 = vst [vmem:[#allocation2 + $0x40] sm:$0xf0] %v292_v18  ;;  %686 = vmatprep.subr.msk.mxu0 %vm427_vm9, %v388_v19 }
  0xbf   : > { %v360_v20 = vpop.permute.xlu1 %359  ;;  %v336_v21 = vpop.permute.xlu0 %335 }
  0xc0   : > { %v364_v22 = vsel %vm361_vm8, %v358_v0, %v360_v20  ;;  %v340_v23 = vsel %vm337_vm7, %v334_v46, %v336_v21  ;;  %v387_v24 = vld [vmem:[#allocation2 + $0x60] sm:$0xf] }
  0xc1   : > { %370 = vst [vmem:[#allocation2 + $0x70] sm:$0xf] %v364_v22  ;;  %346 = vst [vmem:[#allocation2 + $0x58] sm:$0xf0] %v340_v23  ;;  %687 = vmatpush1.msk.msra.mxu0 %vm427_vm9, %v387_v24 }
  0xc2   : > { %688 = vmatmul.mubr.msk.f32.vlgmr.msra.gmra.mrb[0].mxu0 %vm414_vm0, %v835_v7  ;;  %v374_v7 = vld [vmem:[%s936_s1 + $0x18] sm:$0xff] }
  0xc3   : > { %507 = vmatprep.mubr.f32.mxu0 %v782_v8 }
  0xc4   : > { %v383_v27 = vld [vmem:[#allocation2 + $0x40] sm:$0xff] }
  0xc6   : > { %689 = vmatmul.mubr.msk.f32.gmra.mrb[2].mxu0 %vm414_vm0, %v372_v25 }
  0xc7   : > { %513 = vmatprep.mubr.f32.mxu0 %v782_v8 }
  0xc8   : > { %v386_v28 = vld [vmem:[#allocation2 + $0x58] sm:$0xff]  ;;  %v389_v30 = vld [vmem:[#allocation2 + $0x70] sm:$0xf] }
  0xc9   : > { %v737_v29 = vpack.c.bf16 %v386_v28, %v383_v27 }
  0xca   : > { %690 = vmatmul.mubr.msk.f32.gmra.mrb[4].mxu0 %vm414_vm0, %v373_v26 }
  0xcb   : > { %738 = vmatprep.subr.bf16.mxu1 %v737_v29  ;;  %519 = vmatprep.mubr.f32.mxu0 %v782_v8 }
  0xcc   : > { %740 = vmatpush3.bf16.msra.mxu1 %v737_v29 }
  0xcd   : > { %717 = vmatprep.subr.msk.mxu1 %vm427_vm9, %v389_v30 }
  0xce   : > { %691 = vmatmul.mubr.msk.f32.gmra.mrb[6].mxu0 %vm414_vm0, %v374_v7 }
  0xd0   : > { %718 = vmatpush3.msk.msra.mxu1 %vm427_vm9, %v389_v30  ;;  %v397_v8 = vpop.permute.xlu0 %396  ;;  %v402_v32 = vpop.permute.xlu1 %401 }
  0xd1   : > { %720 = vmatmul.mubr.msk.f32.vlgmr.msra.gmra.mrb[0].mxu1 %vm414_vm0, %v372_v25 }
  0xd2   : > { %722 = vmatprep.mubr.msk.f32.mxu1 %vm414_vm0, %v373_v26 }
  0xd4   : > { %v407_v40 = vpop.permute.xlu1 %406  ;;  %v412_v45 = vpop.permute.xlu0 %411 }
  0xd5   : > { %723 = vmatmul.mubr.msk.f32.gmra.mrb[2].mxu1 %vm414_vm0, %v374_v7 }
 0x195   : > { %v503_v31 = vpop.f32.mrb[0].mxu0 }
 0x196   : > { %v504_v33 = vadd.f32 %v503_v31, %v397_v8  ;;  %v505_v34 = vpop.f32.mrb[1].mxu0 }
 0x197   : > { %v506_v35 = vadd.f32 %v505_v34, %v397_v8 }
 0x198   : > { %611 = vst [vmem:[%s918_s20] sm:$0xff] %v504_v33 }
 0x199   : > { %612 = vst [vmem:[%s918_s20 + $0x8] sm:$0xff] %v506_v35  ;;  %v509_v36 = vpop.f32.mrb[2].mxu0 }
 0x19a   : > { %v510_v37 = vadd.f32 %v509_v36, %v402_v32  ;;  %v511_v38 = vpop.f32.mrb[3].mxu0 }
 0x19b   : > { %v512_v39 = vadd.f32 %v511_v38, %v402_v32 }
 0x19c   : > { %614 = vst [vmem:[%s918_s20 + $0x18] sm:$0xff] %v510_v37 }
 0x19d   : > { %615 = vst [vmem:[%s918_s20 + $0x20] sm:$0xff] %v512_v39  ;;  %v515_v41 = vpop.f32.mrb[4].mxu0 }
 0x19e   : > { %v517_v42 = vpop.f32.mrb[5].mxu0  ;;  %v516_v43 = vadd.f32 %v515_v41, %v407_v40 }
 0x19f   : > { %v518_v44 = vadd.f32 %v517_v42, %v407_v40 }
 0x1a0   : > { %617 = vst [vmem:[%s918_s20 + $0x30] sm:$0xff] %v516_v43 }
 0x1a1   : > { %618 = vst [vmem:[%s918_s20 + $0x38] sm:$0xff] %v518_v44  ;;  %v521_v46 = vpop.f32.mrb[6].mxu0 }
 0x1a2   : > { %v522_v47 = vadd.f32 %v521_v46, %v412_v45  ;;  %v523_v48 = vpop.f32.mrb[7].mxu0 }
 0x1a3   : > { %v524_v49 = vadd.f32 %v523_v48, %v412_v45 }
 0x1a4   : > { %v721_v50 = vpop.f32.mrb[0].mxu1  ;;  %620 = vst [vmem:[%s918_s20 + $0x48] sm:$0xff] %v522_v47 }
 0x1a5   : > { %v598_v51 = vadd.f32 %v721_v50, %v402_v32  ;;  %621 = vst [vmem:[%s918_s20 + $0x50] sm:$0xff] %v524_v49  ;;  %v592_v52 = vpop.f32.mrb[1].mxu1 }
 0x1a6   : > { %v593_v53 = vadd.f32 %v592_v52, %v397_v8 }
 0x1a7   : > { %616 = vst [vmem:[%s918_s20 + $0x28] sm:$0xff] %v598_v51 }
 0x1a8   : > { %613 = vst [vmem:[%s918_s20 + $0x10] sm:$0xff] %v593_v53  ;;  %v724_v54 = vpop.f32.mrb[2].mxu1 }
 0x1a9   : > { %v608_v55 = vadd.f32 %v724_v54, %v412_v45  ;;  %v602_v56 = vpop.f32.mrb[3].mxu1 }
 0x1aa   : > { %v603_v57 = vadd.f32 %v602_v56, %v407_v40 }
 0x1ab   : > { %622 = vst [vmem:[%s918_s20 + $0x58] sm:$0xff] %v608_v55 }
 0x1ac   : > { %619 = vst [vmem:[%s918_s20 + $0x40] sm:$0xff] %v603_v57 }
 0x1ad PF: > { %s13_s12 = sadd.s32 1, %s772_s12  }
 0x1ae   : > { %p10_p4 = scmp.ge.s32.totalorder %s13_s12, 4  }
 0x1b0   :  { %12 = sbr.rel (!%p10_p4) target bundleno = 1 (0x1), region = 62 }

</bundles_post_ra>
